<compile_context>
chip_gen: v7x
topology: tpu7x:2x2x1
jax: 0.10.0
libtpu: 0.0.40
codegen_flags: <defaults>
</compile_context>

<pallas_src>
import numpy as np
import jax
import jax.numpy as jnp
from jax.experimental import pallas as pl
from jax.experimental.pallas import tpu as pltpu


# ----------------------------------------------------------------------------
# Compile-time constants: separable Hann taps and banded conv matrices.
# ----------------------------------------------------------------------------
def _separable_taps(filter_size: int) -> np.ndarray:
    """1-D taps t with outer(t, t) == normalized Hann 2-D filter of L2pooling."""
    a = np.hanning(filter_size)[1:-1]
    return (a / a.sum()).astype(np.float32)


def _band_matrix(in_size: int, out_size: int, taps: np.ndarray,
                 stride: int, pad: int) -> np.ndarray:
    """M (in_size, out_size) with (x @ M)[j] = sum_k taps[k]*x[stride*j + k - pad].

    Out-of-range source rows are simply dropped, which implements the zero
    padding of F.conv2d inside the matrix (no jnp.pad needed anywhere).
    """
    m = np.zeros((in_size, out_size), dtype=np.float32)
    for j in range(out_size):
        for kk, tap in enumerate(taps):
            src = stride * j + kk - pad
            if 0 <= src < in_size:
                m[src, j] += np.float32(tap)
    return m


def _pick_c_block(c: int, h: int, w: int, h_out: int, w_out: int,
                  elem_bytes: int = 4,
                  budget_bytes: int = 8 * 1024 * 1024) -> int:
    """Channel block size so the pipelined buffers + f32 temps stay well under
    the scoped VMEM limit (budget sized for v7x's 64 MiB physical VMEM too)."""
    per_chan = elem_bytes * (
        2 * h * w + 2 * h_out * w_out                       # double-buffered in/out
        + h * w + h * w_out + h_out * h + h_out * w_out     # in-kernel f32 temps
    )
    return int(max(1, min(c, budget_bytes // max(per_chan, 1))))


# ----------------------------------------------------------------------------
# Kernel: one (batch, channel-block) tile,  out = sqrt(A @ x^2 @ B + eps).
# ----------------------------------------------------------------------------
def _l2pool_kernel(a_ref, b_ref, x_ref, o_ref):
    """a_ref: (h_out, h), b_ref: (w, w_out), x_ref: (c_blk, h, w),
    o_ref: (c_blk, h_out, w_out)."""
    c_blk, h, w = x_ref.shape
    h_out = a_ref.shape[0]
    w_out = b_ref.shape[1]

    x = x_ref[...].astype(jnp.float32)
    x2 = x * x                                    # squared once (hoisted out of taps)

    # Stride-2 Hann conv along W (lane dim) as a single 2-D MXU matmul.
    t = jnp.dot(x2.reshape(c_blk * h, w), b_ref[...],
                preferred_element_type=jnp.float32)
    t = t.reshape(c_blk, h, w_out)

    # Stride-2 Hann conv along H as a batched MXU matmul (A broadcast over C).
    a_b = jnp.broadcast_to(a_ref[...], (c_blk, h_out, h))
    acc = jax.lax.dot_general(
        a_b, t,
        dimension_numbers=(((2,), (1,)), ((0,), (0,))),
        preferred_element_type=jnp.float32)       # (c_blk, h_out, w_out)

    o_ref[...] = jnp.sqrt(acc + 1e-12).astype(o_ref.dtype)


# ----------------------------------------------------------------------------
# Wrapper.
# ----------------------------------------------------------------------------
def l2pooling(x_nchw: jax.Array, *, filter_size: int = 5, stride: int = 2,
              c_block: int | None = None,
              vmem_limit_bytes: int = 32 * 1024 * 1024) -> jax.Array:
    """Pallas equivalent of L2pooling.forward on an NCHW input."""
    n, c, h, w = x_nchw.shape
    pad = (filter_size - 2) // 2
    k = filter_size - 2
    h_out = (h + 2 * pad - k) // stride + 1
    w_out = (w + 2 * pad - k) // stride + 1

    taps = _separable_taps(filter_size)
    a_mat = jnp.asarray(_band_matrix(h, h_out, taps, stride, pad).T)   # (h_out, h)
    b_mat = jnp.asarray(_band_matrix(w, w_out, taps, stride, pad))     # (w, w_out)

    if c_block is None:
        c_block = _pick_c_block(c, h, w, h_out, w_out)
    grid = (n, pl.cdiv(c, c_block))

    out = pl.pallas_call(
        _l2pool_kernel,
        out_shape=jax.ShapeDtypeStruct((n, c, h_out, w_out), x_nchw.dtype),
        grid=grid,
        in_specs=[
            pl.BlockSpec((h_out, h), lambda b, cb: (0, 0)),
            pl.BlockSpec((w, w_out), lambda b, cb: (0, 0)),
            pl.BlockSpec((None, c_block, h, w), lambda b, cb: (b, cb, 0, 0)),
        ],
        out_specs=pl.BlockSpec((None, c_block, h_out, w_out),
                               lambda b, cb: (b, cb, 0, 0)),
        compiler_params=pltpu.CompilerParams(
            dimension_semantics=("parallel", "parallel"),
            vmem_limit_bytes=vmem_limit_bytes,
        ),
    )(a_mat, b_mat, x_nchw)
    return out


# ----------------------------------------------------------------------------
# Pure-JAX reference (mirrors the PyTorch forward) for verification.
# ----------------------------------------------------------------------------
def _reference(x_nchw: jax.Array, *, filter_size: int = 5, stride: int = 2) -> jax.Array:
    n, c, h, w = x_nchw.shape
    pad = (filter_size - 2) // 2
    a = np.hanning(filter_size)[1:-1]
    g = a[:, None] * a[None, :]
    g = (g / g.sum()).astype(np.float32)
    weight = jnp.broadcast_to(jnp.asarray(g)[None, None], (c, 1, g.shape[0], g.shape[1]))
    out = jax.lax.conv_general_dilated(
        x_nchw.astype(jnp.float32) ** 2,
        weight,
        window_strides=(stride, stride),
        padding=[(pad, pad), (pad, pad)],
        dimension_numbers=("NCHW", "OIHW", "NCHW"),
        feature_group_count=c,
        precision=jax.lax.Precision.HIGHEST,
    )
    return jnp.sqrt(out + 1e-12).astype(x_nchw.dtype)


if __name__ == "__main__":
    key = jax.random.PRNGKey(0)
    x = jax.random.normal(key, (2, 4, 16, 16), dtype=jnp.float32)  # NCHW

    y = l2pooling(x)
    jax.block_until_ready(y)

    y_ref = _reference(x)
    assert y.shape == (2, 4, 8, 8), y.shape
    assert y.dtype == jnp.float32, y.dtype
    # Tolerance accommodates MXU matmul precision for f32 operands.
    np.testing.assert_allclose(np.asarray(y), np.asarray(y_ref), rtol=5e-3, atol=1e-5)

    print("KERNEL_OK")
</pallas_src>

<mosaic_0001>
module attributes {stable_mosaic.version = 11 : i64} {
  func.func @_l2pool_kernel(%arg0: i32, %arg1: i32, %arg2: memref<8x16xf32, #tpu.memory_space<vmem>>, %arg3: memref<16x8xf32, #tpu.memory_space<vmem>>, %arg4: memref<1x4x16x16xf32, #tpu.memory_space<vmem>>, %arg5: memref<1x4x8x8xf32, #tpu.memory_space<vmem>>) attributes {dimension_semantics = [#tpu.dimension_semantics<parallel>, #tpu.dimension_semantics<parallel>], iteration_bounds = array<i64: 2, 1>, scalar_prefetch = 0 : i64, scratch_operands = 0 : i64, tpu.core_type = #tpu.core_type<tc>, window_params = [{pipeline_mode = #tpu.pipeline_mode<synchronous>, transform_indices = @transform_0, window_bounds = array<i64: 8, 16>}, {pipeline_mode = #tpu.pipeline_mode<synchronous>, transform_indices = @transform_1, window_bounds = array<i64: 16, 8>}, {transform_indices = @transform_2, window_bounds = array<i64: 1, 4, 16, 16>}, {transform_indices = @transform_3, window_bounds = array<i64: 1, 4, 8, 8>}]} {
    %c0 = arith.constant 0 : index
    %c0_0 = arith.constant 0 : index
    %c0_1 = arith.constant 0 : index
    %c0_2 = arith.constant 0 : index
    %0 = vector.load %arg4[%c0, %c0_0, %c0_1, %c0_2] : memref<1x4x16x16xf32, #tpu.memory_space<vmem>>, vector<1x4x16x16xf32>
    %1 = vector.shape_cast %0 : vector<1x4x16x16xf32> to vector<4x16x16xf32>
    %2 = arith.mulf %1, %1 : vector<4x16x16xf32>
    %3 = vector.shape_cast %2 : vector<4x16x16xf32> to vector<64x16xf32>
    %c0_3 = arith.constant 0 : index
    %c0_4 = arith.constant 0 : index
    %4 = vector.load %arg3[%c0_3, %c0_4] : memref<16x8xf32, #tpu.memory_space<vmem>>, vector<16x8xf32>
    %cst = arith.constant dense<0.000000e+00> : vector<64x8xf32>
    %5 = tpu.matmul %3, %4, %cst {dimension_numbers = #tpu.dot_dimension_numbers<[1], [0], [0], [1], [0, 0, 1, 1], [], []>} : vector<64x16xf32>, vector<16x8xf32>, vector<64x8xf32> -> vector<64x8xf32>
    %6 = vector.shape_cast %5 : vector<64x8xf32> to vector<4x16x8xf32>
    %c0_5 = arith.constant 0 : index
    %c0_6 = arith.constant 0 : index
    %7 = vector.load %arg2[%c0_5, %c0_6] : memref<8x16xf32, #tpu.memory_space<vmem>>, vector<8x16xf32>
    %8 = vector.shape_cast %7 : vector<8x16xf32> to vector<1x8x16xf32>
    %9 = vector.broadcast %8 : vector<1x8x16xf32> to vector<4x8x16xf32>
    %cst_7 = arith.constant dense<0.000000e+00> : vector<4x8x8xf32>
    %10 = tpu.matmul %9, %6, %cst_7 {dimension_numbers = #tpu.dot_dimension_numbers<[2], [1], [1], [2], [0, 0, 0, 1, 1, 2], [0], [0]>} : vector<4x8x16xf32>, vector<4x16x8xf32>, vector<4x8x8xf32> -> vector<4x8x8xf32>
    %cst_8 = arith.constant 9.99999996E-13 : f32
    %11 = vector.broadcast %cst_8 : f32 to vector<4x8x8xf32>
    %12 = arith.addf %10, %11 : vector<4x8x8xf32>
    %13 = math.sqrt %12 : vector<4x8x8xf32>
    %c0_9 = arith.constant 0 : index
    %c0_10 = arith.constant 0 : index
    %c0_11 = arith.constant 0 : index
    %c0_12 = arith.constant 0 : index
    %14 = vector.load %arg5[%c0_9, %c0_10, %c0_11, %c0_12] : memref<1x4x8x8xf32, #tpu.memory_space<vmem>>, vector<1x4x8x8xf32>
    %15 = vector.shape_cast %14 : vector<1x4x8x8xf32> to vector<4x8x8xf32>
    %16 = vector.shape_cast %13 : vector<4x8x8xf32> to vector<1x4x8x8xf32>
    tpu.vector_store %arg5[%c0_9, %c0_10, %c0_11, %c0_12], %16 {strides = array<i32>} : memref<1x4x8x8xf32, #tpu.memory_space<vmem>>, vector<1x4x8x8xf32>,
    return
  }
  func.func @transform_0(%arg0: i32, %arg1: i32) -> (i32, i32) {
    %c0_i32 = arith.constant 0 : i32
    %c0_i32_0 = arith.constant 0 : i32
    %c0_i32_1 = arith.constant 0 : i32
    return %c0_i32, %c0_i32_0 : i32, i32
  }
  func.func @transform_1(%arg0: i32, %arg1: i32) -> (i32, i32) {
    %c0_i32 = arith.constant 0 : i32
    %c0_i32_0 = arith.constant 0 : i32
    %c0_i32_1 = arith.constant 0 : i32
    return %c0_i32, %c0_i32_0 : i32, i32
  }
  func.func @transform_2(%arg0: i32, %arg1: i32) -> (i32, i32, i32, i32) {
    %c0_i32 = arith.constant 0 : i32
    %c0_i32_0 = arith.constant 0 : i32
    %c0_i32_1 = arith.constant 0 : i32
    return %arg0, %arg1, %c0_i32, %c0_i32_0 : i32, i32, i32, i32
  }
  func.func @transform_3(%arg0: i32, %arg1: i32) -> (i32, i32, i32, i32) {
    %c0_i32 = arith.constant 0 : i32
    %c0_i32_0 = arith.constant 0 : i32
    %c0_i32_1 = arith.constant 0 : i32
    return %arg0, %arg1, %c0_i32, %c0_i32_0 : i32, i32, i32, i32
  }
}

</mosaic_0001>

<bundles_post_ra>
// kernel: tpu_custom_call.1
= control target key start
LH: loop header
LB: loop body
LE: loop exit
PB: predicated region body
PF: predicated region fallthrough
CT: control target
= control target key end

     0   :  { %8 = vsyncpa [#allocation3], 0  ;;  %s1314_s0 = inlined_call_operand.vmem [shape: f32[8,16], index: 0, kind: input, shape index: {}]   ;;  %s1315_s1 = inlined_call_operand.vmem [shape: f32[16,8], index: 1, kind: input, shape index: {}]   ;;  %s1316_s2 = inlined_call_operand.hbm [shape: f32[2,4,16,16], index: 2, kind: input, shape index: {}]   ;;  %s1317_s3 = inlined_call_operand.hbm [shape: f32[2,4,8,8], index: 3, kind: output, shape index: {}]  }
   0x1   :  { %10 = vsyncpa [#allocation3 + $0x1], 0 }
   0x2   :  { %11 = vsyncpa [#allocation4], 0 }
   0x3   :  { %13 = vsyncpa [#allocation4 + $0x1], 0  ;;  %s1109_s12 = smov 0   ;;  %s1111_s13 = smov 0  }
   0x4   :  { %s1113_s14 = smov 0   ;;  %s1115_s15 = smov 0  }
   0x5   :  { %s1117_s16 = smov 0   ;;  %s1119_s17 = smov 0  }
   0x6 LB: > { %s778_s18 = sadd.s32 4294967295, %s1078_s17   ;;  %s779_s19 = sadd.s32 4294967294, %s1078_s17   ;;  %s1078_s17 = sphi %s1119_s17, %s19_s17   ;;  %s1074_s16 = sphi %s1117_s16, %s1332_s16   ;;  %s1070_s15 = sphi %s1115_s15, %s1331_s15   ;;  %s1066_s14 = sphi %s1113_s14, %s1330_s14   ;;  %s1062_s13 = sphi %s1111_s13, %s1329_s13   ;;  %s1058_s12 = sphi %s1109_s12, %s1328_s12  }
   0x7   : > { %s31_s20 = sadd.s32 1, %s1074_s16  ;;  %s82_s21 = sadd.s32 1, %s1066_s14 }
   0x8   : > { %p33_p0 = scmp.ge.s32.totalorder %s31_s20, 2  ;;  %p89_p1 = scmp.ne.s32.totalorder %s1066_s14, %s1062_s13 }
   0x9   : > { %p90_p2 = scmp.eq.s32.totalorder %s1078_s17, 0  ;;  %p95_p3 = scmp.ne.s32.totalorder %s1062_s13, %s1058_s12 }
   0xa   : > { %s1334_s20 = smov (%p33_p0, %s31_s20), 0  ;;  %p96_p5 = scmp.eq.s32.totalorder %s778_s18, 0 }
   0xb   : > { %p1150_p4 = por %p90_p2, %p89_p1  ;;  %s77_s23 = ssub.s32 %s1074_s16, %s1334_s20 }
   0xc   : > { %p121_p6 = scmp.eq.s32.totalorder %s778_s18, 1  ;;  %p80_p7 = scmp.eq.s32.totalorder %s77_s23, 0 }
   0xd   : > { %p1156_p8 = por %p96_p5, %p95_p3  ;;  %p127_p10 = scmp.eq.s32.totalorder %s779_s19, 1 }
   0xe   : > { %p1160_p9 = por %p121_p6, %p89_p1  ;;  %p901_p13 = scmp.lt.s32.totalorder %s1078_s17, 2 }
   0xf   : > { %s1165_s26 = scalar_select %p80_p7, %s1066_s14, %s82_s21  }
  0x10   : > { %s1321_s25 = scalar_select %p1160_p9, 1, 0 }
  0x11   : > { %p1167_p11 = por %p127_p10, %p95_p3  ;;  %s153_s28 = sand.u32 1, %s1066_s14  }
  0x12   : > { %s782_s29 = sshll.u32 %s153_s28, 6  ;;  %s805_s30 = sshll.u32 %s1074_s16, 10 }
  0x13   : > { %s1322_s27 = scalar_select %p1167_p11, 1, 0 }
  0x14   : > { %s1178_s6 = scalar_lea.hbm %s1316_s2, %s805_s30  ;;  %s157_s7 = scalar_lea.vmem [#allocation2], %s782_s29 }
  0x15   : > { %s167_s8 = sshll.u32 %s157_s7, 4  ;;  %p1184_p0 = pnand %p901_p13, %p1150_p4  ;;  %s1180_s8 = int_to_ptr.vmem [resolvable:$true] %s167_s8 }
  0x16   : > { %s1189_s10 = scalar_lea.sflag [#allocation3], %s153_s28  ;;  %s966_s11 = scalar_lea.hbm %s1178_s6, 1024 }
  0x17   : > { %p967_p2 = scmp.ne.s32.totalorder %s1178_s6, %s966_s11  ;;  %p968_p3 = pneg %p1184_p0 }
  0x18   : > { %s971_s21 = scalar_lea.hbm %s1316_s2, 2048  ;;  %p972_p4 = scmp.lt.u32.totalorder %s1178_s6, %s1316_s2 }
  0x19   : > { %p969_p5 = pnand %p968_p3, %p967_p2  ;;  %p973_p7 = scmp.lt.u32.totalorder %s971_s21, %s966_s11 }
  0x1a   : > { %p975_p13 = scmp.lt.u32.totalorder %s966_s11, %s1178_s6 }
  0x1b   : > { %p970_p6 = pneg %p969_p5  ;;  %p974_p10 = por %p973_p7, %p972_p4 }
  0x1d   : > { %p976_p12 = por %p975_p13, %p974_p10 }
  0x1f   : > { %p977_p1 = pnand %p976_p12, %p970_p6 }
  0x21   : > { %980 = shalt.err (!%p977_p1)
}
  0x22   : > { %s981_s28 = scalar_lea.vmem %s1180_s8, 1024  ;;  %s1080_s29 = smov [#allocation2]  }
  0x23   : > { %p982_p2 = scmp.ne.s32.totalorder %s1180_s8, %s981_s28  ;;  %s986_s30 = sshll.u32 %s1080_s29, 4  ;;  %s987_s30 = int_to_ptr.vmem [resolvable:$false] %s986_s30 }
  0x24   : > { %s988_s4 = scalar_lea.vmem %s987_s30, 2048  ;;  %p989_p9 = scmp.lt.s32.totalorder %s1180_s8, %s987_s30 }
  0x25   : > { %p984_p5 = pnand %p982_p2, %p968_p3  ;;  %p990_p4 = scmp.lt.s32.totalorder %s988_s4, %s981_s28 }
  0x27   : > { %p985_p11 = pneg %p984_p5  ;;  %p991_p7 = por %p990_p4, %p989_p9 }
  0x29   : > { %p992_p10 = pnand %p991_p7, %p985_p11 }
  0x2b   : > { %995 = shalt.err (!%p992_p10)
}
  0x2c   : > { %s1081_s5 = smov 128   ;;  %s1082_s7 = smov 8  }
  0x2d   : > { %896 = dma.hbm_to_vmem [thread:$0]  (!%p1184_p0), %s1178_s6, 1024, %s1180_s8, %s1189_s10, %s1081_s5, %s1081_s5, %s1082_s7  }
  0x2e   : > { %p175_p12 = scmp.lt.s32.totalorder %s1078_s17, 3  ;;  %p1324_p1 = scmp.ge.s32.totalorder %s1078_s17, 1 }
  0x30   : > { %p176_p3 = pnand %p1324_p1, %p175_p12 }
  0x31   : > { %s1221_s11 = sand.u32 (!%p176_p3), 1, %s1062_s13  }
  0x32   : > { %179 = sbr.rel (%p176_p3) target bundleno = 539 (0x21b), region = 32  ;;  %s786_s18 = sshll.u32 (!%p176_p3), %s1221_s11, 6 }
  0x33   : > { %s182_s19 = scalar_lea.sflag (!%p176_p3), [#allocation3], %s1221_s11  ;;  %s185_s21 = scalar_lea.vmem (!%p176_p3), [#allocation2], %s786_s18 }
  0x39   : > { %1049 = dma.done.wait (%p1156_p8), %s182_s19, 1024  }
  0x3a   : > { %1051 = vsyncadd (%p1156_p8), %s182_s19, 4294966272  ;;  %v226_v0 = vld [vmem:[%s1315_s1] sm:$0xff]  ;;  %v227_v1 = vld [vmem:[%s1315_s1 + $0x8] sm:$0xff]  ;;  %vm228_vm0 = vcmask 130048   ;;  %v1083_v19 = vmov 0.0|0.0   ;;  %vm1084_vm1 = vmmov 0  }
  0x3b   : > { %v210_v2 = vld [vmem:[%s185_s21] sm:$0xff]  ;;  %v873_v3 = vpack.c.bf16 %v227_v1, %v226_v0  ;;  %v211_v5 = vld [vmem:[%s185_s21 + $0x8] sm:$0xff]  ;;  %v212_v6 = vld [vmem:[%s185_s21 + $0x10] sm:$0xff]  ;;  %877 = vmatprep.subr.bf16.mxu1 %v1083_v19  ;;  %v1085_v20 = vmov 0.0   ;;  %s787_s23 = sshll.u32 %s1221_s11, 5  ;;  %vm670_vm3 = vcmask 64512  }
  0x3c   : > { %v218_v4 = vmul.f32 %v210_v2, %v210_v2  ;;  %v219_v7 = vmul.f32 %v211_v5, %v211_v5  ;;  %v220_v8 = vmul.f32 %v212_v6, %v212_v6  ;;  %v213_v9 = vld [vmem:[%s185_s21 + $0x18] sm:$0xff]  ;;  %v214_v10 = vld [vmem:[%s185_s21 + $0x20] sm:$0xff]  ;;  %v215_v13 = vld [vmem:[%s185_s21 + $0x28] sm:$0xff]  ;;  %849 = vmatprep.mubr.msk.f32.mxu1 %vm1084_vm1, %v1085_v20  ;;  %s207_s28 = scalar_lea.vmem [#allocation5], %s787_s23  ;;  %s806_s29 = sshll.u32 %s1070_s15, 9 }
  0x3d   : > { %874 = vmatprep.subr.bf16.mxu0 %v873_v3  ;;  %v221_v11 = vmul.f32 %v213_v9, %v213_v9  ;;  %v222_v12 = vmul.f32 %v214_v10, %v214_v10  ;;  %v216_v14 = vld [vmem:[%s185_s21 + $0x30] sm:$0xff]  ;;  %v223_v15 = vmul.f32 %v215_v13, %v215_v13  ;;  %v217_v17 = vld [vmem:[%s185_s21 + $0x38] sm:$0xff]  ;;  %v358_v25 = vld [vmem:[%s1314_s0] sm:$0xff]  ;;  %s691_s30 = sshll.u32 %s207_s28, 4  ;;  %s1262_s7 = scalar_lea.hbm %s1317_s3, %s806_s29  ;;  %s1264_s30 = int_to_ptr.vmem [resolvable:$true] %s691_s30 }
  0x3e   : > { %833 = vmatprep.mubr.msk.f32.mxu0 %vm228_vm0, %v218_v4  ;;  %876 = vmatpush3.bf16.msra.mxu0 %v873_v3  ;;  %v224_v16 = vmul.f32 %v216_v14, %v216_v14  ;;  %v225_v18 = vmul.f32 %v217_v17, %v217_v17  ;;  %s676_s15 = scalar_lea.sflag [#allocation4], %s1221_s11  ;;  %s996_s18 = scalar_lea.vmem %s1264_s30, 512 }
  0x3f   : > { %p997_p8 = scmp.ne.s32.totalorder %s1264_s30, %s996_s18  ;;  %p1325_p9 = scmp.ne.s32.totalorder %s1321_s25, 0 }
  0x40   : > { %s1086_s19 = smov [#allocation5]  }
  0x41   : > { %834 = vmatmul.mubr.msk.f32.vlgmr.msra.gmra.mrb[0].mxu0 %vm228_vm0, %v219_v7  ;;  %p998_p11 = pnand %p997_p8, %p1325_p9  ;;  %s1000_s21 = sshll.u32 %s1086_s19, 4  ;;  %s1001_s21 = int_to_ptr.vmem [resolvable:$false] %s1000_s21 }
  0x42   : > { %836 = vmatprep.mubr.msk.f32.mxu0 %vm228_vm0, %v220_v8  ;;  %s1002_s9 = scalar_lea.vmem %s1001_s21, 1024  ;;  %p1003_p6 = scmp.lt.s32.totalorder %s1264_s30, %s1001_s21 }
  0x43   : > { %p999_p0 = pneg %p998_p11  ;;  %p1004_p13 = scmp.lt.s32.totalorder %s1002_s9, %s996_s18 }
  0x45   : > { %837 = vmatmul.mubr.msk.f32.gmra.mrb[2].mxu0 %vm228_vm0, %v221_v11  ;;  %p1005_p2 = por %p1004_p13, %p1003_p6 }
  0x46   : > { %839 = vmatprep.mubr.msk.f32.mxu0 %vm228_vm0, %v222_v12 }
  0x47   : > { %p1006_p5 = pnand %p1005_p2, %p999_p0 }
  0x49   : > { %840 = vmatmul.mubr.msk.f32.gmra.mrb[4].mxu0 %vm228_vm0, %v223_v15 }
  0x4a   : > { %842 = vmatprep.mubr.msk.f32.mxu0 %vm228_vm0, %v224_v16 }
  0x4d   : > { %843 = vmatmul.mubr.msk.f32.gmra.mrb[6].mxu0 %vm228_vm0, %v225_v18 }
 0x114   : > { %v835_v21 = vpop.f32.mrb[0].mxu0 }
 0x115   : > { %v319_v22 = vpop.f32.mrb[1].mxu0 }
 0x116   : > { %v878_v23 = vpack.c.bf16 %v835_v21, %v319_v22 }
 0x118   : > { %v838_v24 = vpop.f32.mrb[2].mxu0  ;;  %879 = vmatpush3.bf16.msra.mxu1 %v878_v23 }
 0x119   : > { %v329_v26 = vpop.f32.mrb[3].mxu0  ;;  %880 = vmatprep.subr.bf16.mxu1 %v1083_v19 }
 0x11a   : > { %v881_v27 = vpack.c.bf16 %v838_v24, %v329_v26 }
 0x11b   : > { %850 = vmatmul.mubr.msk.f32.vlgmr.msra.gmra.mrb[0].mxu1 %vm228_vm0, %v358_v25 }
 0x11c   : > { %v841_v28 = vpop.f32.mrb[4].mxu0  ;;  %882 = vmatpush3.bf16.msra.mxu1 %v881_v27  ;;  %856 = vmatprep.mubr.msk.f32.mxu1 %vm1084_vm1, %v1085_v20 }
 0x11d   : > { %v339_v29 = vpop.f32.mrb[5].mxu0  ;;  %883 = vmatprep.subr.bf16.mxu1 %v1083_v19 }
 0x11e   : > { %v884_v30 = vpack.c.bf16 %v841_v28, %v339_v29 }
 0x11f   : > { %857 = vmatmul.mubr.msk.f32.vlgmr.msra.gmra.mrb[2].mxu1 %vm228_vm0, %v358_v25 }
 0x120   : > { %v844_v31 = vpop.f32.mrb[6].mxu0  ;;  %885 = vmatpush3.bf16.msra.mxu1 %v884_v30  ;;  %863 = vmatprep.mubr.msk.f32.mxu1 %vm1084_vm1, %v1085_v20 }
 0x121   : > { %v349_v32 = vpop.f32.mrb[7].mxu0  ;;  %886 = vmatprep.subr.bf16.mxu1 %v1083_v19 }
 0x122   : > { %v887_v33 = vpack.c.bf16 %v844_v31, %v349_v32 }
 0x123   : > { %864 = vmatmul.mubr.msk.f32.vlgmr.msra.gmra.mrb[4].mxu1 %vm228_vm0, %v358_v25 }
 0x124   : > { %888 = vmatpush3.bf16.msra.mxu1 %v887_v33  ;;  %870 = vmatprep.mubr.msk.f32.mxu1 %vm1084_vm1, %v1085_v20 }
 0x127   : > { %871 = vmatmul.mubr.msk.f32.vlgmr.msra.gmra.mrb[6].mxu1 %vm228_vm0, %v358_v25 }
 0x1ee   : > { %v428_v34 = vpop.f32.mrb[0].mxu1 }
 0x1ef   : > { %v429_v35 = vadd.f32 1e-12, %v428_v34  ;;  %v851_v36 = vpop.f32.mrb[1].mxu1 }
 0x1f1   : > { %958 = vrsqrt.f32 %v429_v35  ;;  %vm644_vm2 = vcmp.eq.f32.partialorder %v429_v35, inf  ;;  %v647_v48 = vand.u32 2147483648, %v429_v35  ;;  %vm646_vm4 = vcmp.eq.f32.partialorder %v429_v35, 0.0 }
 0x1f2   : > { %v498_v37 = vpop.f32.mrb[2].mxu1 }
 0x1f3   : > { %v499_v38 = vadd.f32 1e-12, %v498_v37  ;;  %v858_v39 = vpop.f32.mrb[3].mxu1 }
 0x1f5   : > { %960 = vrsqrt.f32 %v499_v38  ;;  %vm651_vm5 = vcmp.eq.f32.partialorder %v499_v38, inf  ;;  %v654_v53 = vand.u32 2147483648, %v499_v38  ;;  %vm653_vm6 = vcmp.eq.f32.partialorder %v499_v38, 0.0 }
 0x1f6   : > { %v568_v40 = vpop.f32.mrb[4].mxu1 }
 0x1f7   : > { %v569_v41 = vadd.f32 1e-12, %v568_v40  ;;  %v865_v42 = vpop.f32.mrb[5].mxu1 }
 0x1f9   : > { %962 = vrsqrt.f32 %v569_v41  ;;  %vm658_vm7 = vcmp.eq.f32.partialorder %v569_v41, inf  ;;  %v661_v58 = vand.u32 2147483648, %v569_v41  ;;  %vm660_vm8 = vcmp.eq.f32.partialorder %v569_v41, 0.0 }
 0x1fa   : > { %v638_v43 = vpop.f32.mrb[6].mxu1 }
 0x1fb   : > { %v959_v44 = vpop.eup %958  ;;  %v639_v45 = vadd.f32 1e-12, %v638_v43  ;;  %v872_v46 = vpop.f32.mrb[7].mxu1 }
 0x1fc   : > { %v643_v47 = vmul.f32 %v959_v44, %v429_v35 }
 0x1fd   : > { %964 = vrsqrt.f32 %v639_v45  ;;  %vm665_vm9 = vcmp.eq.f32.partialorder %v639_v45, inf  ;;  %v668_v63 = vand.u32 2147483648, %v639_v45  ;;  %vm667_vm10 = vcmp.eq.f32.partialorder %v639_v45, 0.0 }
 0x1fe   : > { %v645_v49 = vsel %vm644_vm2, %v429_v35, %v643_v47 }
 0x1ff   : > { %v961_v50 = vpop.eup %960  ;;  %v648_v51 = vsel %vm646_vm4, %v647_v48, %v645_v49 }
 0x200   : > { %v650_v52 = vmul.f32 %v961_v50, %v499_v38  ;;  %671 = vst.msk [vmem:[%s207_s28] sm:$0xff] %vm670_vm3, %v648_v51 }
 0x202   : > { %v652_v54 = vsel %vm651_vm5, %v499_v38, %v650_v52 }
 0x203   : > { %v963_v55 = vpop.eup %962  ;;  %v655_v56 = vsel %vm653_vm6, %v654_v53, %v652_v54 }
 0x204   : > { %v657_v57 = vmul.f32 %v963_v55, %v569_v41  ;;  %672 = vst.msk [vmem:[%s207_s28 + $0x8] sm:$0xff] %vm670_vm3, %v655_v56 }
 0x206   : > { %v659_v59 = vsel %vm658_vm7, %v569_v41, %v657_v57 }
 0x207   : > { %v965_v60 = vpop.eup %964  ;;  %v662_v61 = vsel %vm660_vm8, %v661_v58, %v659_v59 }
 0x208   : > { %v664_v62 = vmul.f32 %v965_v60, %v639_v45  ;;  %673 = vst.msk [vmem:[%s207_s28 + $0x10] sm:$0xff] %vm670_vm3, %v662_v61 }
 0x20a   : > { %v666_v0 = vsel %vm665_vm9, %v639_v45, %v664_v62 }
 0x20b   : > { %v669_v1 = vsel %vm667_vm10, %v668_v63, %v666_v0 }
 0x20c   : > { %674 = vst.msk [vmem:[%s207_s28 + $0x18] sm:$0xff] %vm670_vm3, %v669_v1 }
 0x20d   : > { %1009 = shalt.err (!%p1006_p5)
}
 0x20e   : > { %s1010_s6 = scalar_lea.hbm %s1262_s7, 512  ;;  %s1014_s24 = scalar_lea.hbm %s1317_s3, 1024 }
 0x20f   : > { %p1011_p4 = scmp.ne.s32.totalorder %s1262_s7, %s1010_s6  ;;  %p1015_p12 = scmp.lt.u32.totalorder %s1262_s7, %s1317_s3 }
 0x210   : > { %p1016_p1 = scmp.lt.u32.totalorder %s1014_s24, %s1010_s6  ;;  %p1018_p8 = scmp.lt.u32.totalorder %s1010_s6, %s1262_s7 }
 0x211   : > { %p1012_p7 = pnand %p1011_p4, %p1325_p9 }
 0x212   : > { %p1017_p3 = por %p1016_p1, %p1015_p12 }
 0x213   : > { %p1013_p10 = pneg %p1012_p7 }
 0x214   : > { %p1019_p11 = por %p1018_p8, %p1017_p3 }
 0x216   : > { %p1020_p0 = pnand %p1019_p11, %p1013_p10 }
 0x218   : > { %1023 = shalt.err (!%p1020_p0)
}
 0x219   : > { %s1087_s28 = smov 128   ;;  %s1088_s29 = smov 8  }
 0x21a   : > { %891 = dma.vmem_to_hbm [thread:$0]  (%p1325_p9), %s1264_s30, 512, %s1262_s7, %s676_s15, %s1087_s28, %s1087_s28, %s1088_s29  }
 0x21b PF: > { %s706_s4 = sand.u32 1, %s1058_s12   ;;  %p1326_p6 = scmp.ne.s32.totalorder %s1322_s27, 0 }
 0x21c   : > { %p1327_p13 = scmp.ge.s32.totalorder %s1078_s17, 2  ;;  %s707_s5 = scalar_lea.sflag [#allocation4], %s706_s4 }
 0x21e   : > { %p898_p2 = pnand %p1327_p13, %p1326_p6 }
 0x220   : > { %1053 = dma.done.wait (!%p898_p2), %s707_s5, 512  }
 0x221   : > { %1055 = vsyncadd (!%p898_p2), %s707_s5, 4294966784  ;;  %s19_s17 = sadd.s32 1, %s1078_s17   ;;  %s1328_s12 = smov %s1062_s13 }
 0x222   : > { %p16_p5 = scmp.ge.s32.totalorder %s19_s17, 4   ;;  %s1329_s13 = smov %s1066_s14 }
 0x223   : > { %s1330_s14 = smov %s1165_s26  ;;  %s1331_s15 = smov %s1074_s16 }
 0x224   : > { %s1332_s16 = smov %s1334_s20  ;;  %18 = sbr.rel (!%p16_p5) target bundleno = 6 (0x6), region = 77 }
 0x22b   :  { %712 = vsyncpa [#allocation3], 1 }
 0x22c   :  { %714 = vsyncpa [#allocation3 + $0x1], 1 }
 0x22d   :  { %715 = vsyncpa [#allocation4], 1 }
 0x22e   :  { %717 = vsyncpa [#allocation4 + $0x1], 1 }

</bundles_post_ra>
